<compile_context>
chip_gen: v7x
topology: tpu7x:2x2x1
jax: 0.10.0
libtpu: 0.0.40
codegen_flags: <defaults>
</compile_context>

<pallas_src>
import math

import jax
import jax.numpy as jnp
from jax.experimental import pallas as pl
from jax.experimental.pallas import tpu as pltpu


def _make_hard_kernel():
    """Running hard-max over the T (reduction) grid axis."""

    def kernel(x_ref, o_ref, acc_ref):
        k = pl.program_id(2)

        @pl.when(k == 0)
        def _init():
            acc_ref[...] = jnp.full_like(acc_ref, -jnp.inf)

        blk = x_ref[...].astype(jnp.float32)                      # (1, Tt, Dt)
        acc_ref[...] = jnp.maximum(acc_ref[...],
                                   jnp.max(blk, axis=1, keepdims=True))

        @pl.when(k == pl.num_programs(2) - 1)
        def _finalize():
            o_ref[...] = acc_ref[...].astype(o_ref.dtype)

    return kernel


def _make_soft_kernel(scale: float):
    """Online softmax-weighted sum:  sum_t softmax(scale*x)[t] * x[t]."""
    s = float(scale)

    def kernel(x_ref, o_ref, m_ref, l_ref, acc_ref):
        k = pl.program_id(2)

        @pl.when(k == 0)
        def _init():
            m_ref[...] = jnp.full_like(m_ref, -jnp.inf)
            l_ref[...] = jnp.zeros_like(l_ref)
            acc_ref[...] = jnp.zeros_like(acc_ref)

        x = x_ref[...].astype(jnp.float32)                        # (1, Tt, Dt)
        z = x * s                                                 # logits
        m_prev = m_ref[...]
        m_new = jnp.maximum(m_prev, jnp.max(z, axis=1, keepdims=True))
        alpha = jnp.exp(m_prev - m_new)
        p = jnp.exp(z - m_new)                                    # (1, Tt, Dt)
        l_ref[...] = alpha * l_ref[...] + jnp.sum(p, axis=1, keepdims=True)
        acc_ref[...] = alpha * acc_ref[...] + jnp.sum(p * x, axis=1, keepdims=True)
        m_ref[...] = m_new

        @pl.when(k == pl.num_programs(2) - 1)
        def _finalize():
            o_ref[...] = (acc_ref[...] / l_ref[...]).astype(o_ref.dtype)

    return kernel


def _pick_tiles(T, D, itemsize, target_block_bytes):
    """Choose (Tt, Dt) block extents.

    Dt: full D, or an even lane-dense split (multiple of 128) when D is large.
    Tt: must divide T exactly (padded reduction rows would corrupt the result)
        and be a multiple of 8; falls back to the full extent otherwise.
    """
    Dt = D
    if D > 1024:
        for cand in (1024, 512, 256, 128):
            if D % cand == 0:
                Dt = cand
                break

    Tt = T
    if T * Dt * itemsize > target_block_bytes:
        best = None
        cand = 8
        while cand < T:
            if T % cand == 0 and cand * Dt * itemsize <= target_block_bytes:
                best = cand
            cand += 8
        if best is not None:
            Tt = best
    return Tt, Dt


def _maxish_pallas_3d(x3, scale, target_block_bytes):
    B, T, D = x3.shape
    Tt, Dt = _pick_tiles(T, D, x3.dtype.itemsize, target_block_bytes)
    nT = T // Tt
    nD = D // Dt
    grid = (B, nD, nT)

    in_spec = pl.BlockSpec((1, Tt, Dt), lambda b, j, k: (b, k, j))
    out_spec = pl.BlockSpec((1, 1, Dt), lambda b, j, k: (b, 0, j))

    if scale > 0:
        kernel = _make_soft_kernel(scale)
        scratch = [pltpu.VMEM((1, 1, Dt), jnp.float32)] * 3      # m, l, acc
    else:
        kernel = _make_hard_kernel()
        scratch = [pltpu.VMEM((1, 1, Dt), jnp.float32)]          # acc

    return pl.pallas_call(
        kernel,
        out_shape=jax.ShapeDtypeStruct((B, 1, D), x3.dtype),
        grid_spec=pltpu.PrefetchScalarGridSpec(
            num_scalar_prefetch=0,
            grid=grid,
            in_specs=[in_spec],
            out_specs=out_spec,
            scratch_shapes=scratch,
        ),
        compiler_params=pltpu.CompilerParams(
            dimension_semantics=("parallel", "parallel", "arbitrary"),
        ),
    )(x3)


def maxish_forward(x, scale, dim=1, *, min_pallas_bytes=0,
                   target_block_bytes=2 * 1024 * 1024):
    """Pallas equivalent of Maxish().forward(x, scale, dim).

    `scale` must be a host-side Python/NumPy scalar (the PyTorch module branches
    on `scale > 0` at the Python level), so the branch and constant are baked
    into the traced kernel. The Expression wrapper of the original code is a
    host-side convenience: pass `expr.value` here.
    """
    x = jnp.asarray(x)
    axis = dim % x.ndim
    shape = x.shape
    T = shape[axis]
    B = math.prod(shape[:axis])
    D = math.prod(shape[axis + 1:])
    out_shape = shape[:axis] + (1,) + shape[axis + 1:]

    # Per perf review: a trivially fusible reduction on tiny inputs is better
    # left to XLA. Default threshold is 0 so the Pallas kernel always runs.
    if x.size * x.dtype.itemsize < min_pallas_bytes:
        if scale > 0:
            return jnp.sum(jax.nn.softmax(x * scale, axis=axis) * x,
                           axis=axis, keepdims=True)
        return jnp.max(x, axis=axis, keepdims=True)

    x3 = x.reshape(B, T, D)   # metadata-only reshape (contiguous axis groups)
    out3 = _maxish_pallas_3d(x3, float(scale), target_block_bytes)
    return out3.reshape(out_shape)


if __name__ == "__main__":
    key = jax.random.PRNGKey(0)

    # [batch_size, max_dim (time), x_dim], as in the Maxish docstring.
    B, T, D = 2, 8, 32
    x = jax.random.normal(key, (B, T, D), dtype=jnp.float32)

    # --- hard-max path (scale <= 0), default dim=1 ---
    out_hard = jax.block_until_ready(maxish_forward(x, scale=0, dim=1))
    ref_hard = jnp.max(x, axis=1, keepdims=True)
    assert out_hard.shape == (B, 1, D)
    assert jnp.allclose(out_hard, ref_hard, atol=1e-6), "hard-max mismatch"

    # --- soft-max path (scale > 0) ---
    scale = 3.0
    out_soft = jax.block_until_ready(maxish_forward(x, scale=scale, dim=1))
    ref_soft = jnp.sum(jax.nn.softmax(x * scale, axis=1) * x,
                       axis=1, keepdims=True)
    assert out_soft.shape == (B, 1, D)
    assert jnp.allclose(out_soft, ref_soft, atol=1e-5, rtol=1e-5), \
        "soft-max mismatch"

    # --- chunked-reduction path: force multiple T tiles with a tiny block cap ---
    x2 = jax.random.normal(jax.random.PRNGKey(0), (2, 32, 32), dtype=jnp.float32)
    out_h2 = jax.block_until_ready(
        maxish_forward(x2, scale=0, dim=1, target_block_bytes=1024))
    assert jnp.allclose(out_h2, jnp.max(x2, axis=1, keepdims=True), atol=1e-6), \
        "chunked hard-max mismatch"
    out_s2 = jax.block_until_ready(
        maxish_forward(x2, scale=2.0, dim=1, target_block_bytes=1024))
    ref_s2 = jnp.sum(jax.nn.softmax(x2 * 2.0, axis=1) * x2,
                     axis=1, keepdims=True)
    assert jnp.allclose(out_s2, ref_s2, atol=1e-5, rtol=1e-5), \
        "chunked soft-max mismatch"

    print("KERNEL_OK")
</pallas_src>

<mosaic_0001>
module attributes {stable_mosaic.version = 11 : i64} {
  func.func @kernel(%arg0: i32, %arg1: i32, %arg2: i32, %arg3: memref<1x8x32xf32, #tpu.memory_space<vmem>>, %arg4: memref<1x1x32xf32, #tpu.memory_space<vmem>>, %arg5: memref<1x1x32xf32, #tpu.memory_space<vmem>>) attributes {dimension_semantics = [#tpu.dimension_semantics<parallel>, #tpu.dimension_semantics<parallel>, #tpu.dimension_semantics<arbitrary>], iteration_bounds = array<i64: 2, 1, 1>, scalar_prefetch = 0 : i64, scratch_operands = 1 : i64, tpu.core_type = #tpu.core_type<tc>, window_params = [{transform_indices = @transform_0, window_bounds = array<i64: 1, 8, 32>}, {transform_indices = @transform_1, window_bounds = array<i64: 1, 1, 32>}]} {
    %c0_i32 = arith.constant 0 : i32
    %0 = arith.cmpi eq, %arg2, %c0_i32 : i32
    %1 = arith.extui %0 : i1 to i32
    %c0_i32_0 = arith.constant 0 : i32
    %2 = arith.cmpi ne, %1, %c0_i32_0 : i32
    scf.if %2 {
      %cst_11 = arith.constant 0xFF800000 : f32
      %12 = vector.broadcast %cst_11 : f32 to vector<1x1x32xf32>
      %c0_12 = arith.constant 0 : index
      %c0_13 = arith.constant 0 : index
      %c0_14 = arith.constant 0 : index
      %13 = vector.load %arg5[%c0_12, %c0_13, %c0_14] : memref<1x1x32xf32, #tpu.memory_space<vmem>>, vector<1x1x32xf32>
      tpu.vector_store %arg5[%c0_12, %c0_13, %c0_14], %12 {strides = array<i32>} : memref<1x1x32xf32, #tpu.memory_space<vmem>>, vector<1x1x32xf32>,
    } else {
    }
    %c0 = arith.constant 0 : index
    %c0_1 = arith.constant 0 : index
    %c0_2 = arith.constant 0 : index
    %3 = vector.load %arg3[%c0, %c0_1, %c0_2] : memref<1x8x32xf32, #tpu.memory_space<vmem>>, vector<1x8x32xf32>
    %c0_3 = arith.constant 0 : index
    %c0_4 = arith.constant 0 : index
    %c0_5 = arith.constant 0 : index
    %4 = vector.load %arg5[%c0_3, %c0_4, %c0_5] : memref<1x1x32xf32, #tpu.memory_space<vmem>>, vector<1x1x32xf32>
    %cst = arith.constant dense<0xFF800000> : vector<1x32xf32>
    %5 = vector.multi_reduction <maximumf>, %3, %cst [1] : vector<1x8x32xf32> to vector<1x32xf32>
    %6 = vector.shape_cast %5 : vector<1x32xf32> to vector<1x1x32xf32>
    %7 = arith.maximumf %4, %6 : vector<1x1x32xf32>
    %c0_6 = arith.constant 0 : index
    %c0_7 = arith.constant 0 : index
    %c0_8 = arith.constant 0 : index
    %8 = vector.load %arg5[%c0_6, %c0_7, %c0_8] : memref<1x1x32xf32, #tpu.memory_space<vmem>>, vector<1x1x32xf32>
    tpu.vector_store %arg5[%c0_6, %c0_7, %c0_8], %7 {strides = array<i32>} : memref<1x1x32xf32, #tpu.memory_space<vmem>>, vector<1x1x32xf32>,
    %c0_i32_9 = arith.constant 0 : i32
    %9 = arith.cmpi eq, %arg2, %c0_i32_9 : i32
    %10 = arith.extui %9 : i1 to i32
    %c0_i32_10 = arith.constant 0 : i32
    %11 = arith.cmpi ne, %10, %c0_i32_10 : i32
    scf.if %11 {
      %c0_11 = arith.constant 0 : index
      %c0_12 = arith.constant 0 : index
      %c0_13 = arith.constant 0 : index
      %12 = vector.load %arg5[%c0_11, %c0_12, %c0_13] : memref<1x1x32xf32, #tpu.memory_space<vmem>>, vector<1x1x32xf32>
      %c0_14 = arith.constant 0 : index
      %c0_15 = arith.constant 0 : index
      %c0_16 = arith.constant 0 : index
      %13 = vector.load %arg4[%c0_14, %c0_15, %c0_16] : memref<1x1x32xf32, #tpu.memory_space<vmem>>, vector<1x1x32xf32>
      tpu.vector_store %arg4[%c0_14, %c0_15, %c0_16], %12 {strides = array<i32>} : memref<1x1x32xf32, #tpu.memory_space<vmem>>, vector<1x1x32xf32>,
    } else {
    }
    return
  }
  func.func @transform_0(%arg0: i32, %arg1: i32, %arg2: i32) -> (i32, i32, i32) {
    %c0_i32 = arith.constant 0 : i32
    return %arg0, %arg2, %arg1 : i32, i32, i32
  }
  func.func @transform_1(%arg0: i32, %arg1: i32, %arg2: i32) -> (i32, i32, i32) {
    %c0_i32 = arith.constant 0 : i32
    %c0_i32_0 = arith.constant 0 : i32
    return %arg0, %c0_i32, %arg1 : i32, i32, i32
  }
}

</mosaic_0001>

<bundles_post_ra>
// kernel: tpu_custom_call.1
= control target key start
LH: loop header
LB: loop body
LE: loop exit
PB: predicated region body
PF: predicated region fallthrough
CT: control target
= control target key end

     0   :  { %6 = vsyncpa [#allocation4], 0  ;;  %s653_s0 = inlined_call_operand.hbm [shape: f32[2,8,32], index: 0, kind: input, shape index: {}]   ;;  %s654_s1 = inlined_call_operand.hbm [shape: f32[2,1,32], index: 1, kind: output, shape index: {}]  }
   0x1   :  { %8 = vsyncpa [#allocation4 + $0x1], 0 }
   0x2   :  { %9 = vsyncpa [#allocation5], 0 }
   0x3   :  { %11 = vsyncpa [#allocation5 + $0x1], 0  ;;  %s477_s6 = smov 0   ;;  %s479_s7 = smov 0  }
   0x4   :  { %s481_s8 = smov 0   ;;  %s483_s9 = smov 0  }
   0x5   :  { %s485_s10 = smov 0   ;;  %s487_s11 = smov 0  }
   0x6 LB: > { %s276_s12 = sadd.s32 4294967295, %s462_s11   ;;  %s277_s13 = sadd.s32 4294967294, %s462_s11   ;;  %s462_s11 = sphi %s487_s11, %s17_s11   ;;  %s458_s10 = sphi %s485_s10, %s670_s10   ;;  %s454_s9 = sphi %s483_s9, %s669_s9   ;;  %s450_s8 = sphi %s481_s8, %s668_s8   ;;  %s446_s7 = sphi %s479_s7, %s667_s7   ;;  %s442_s6 = sphi %s477_s6, %s666_s6  }
   0x7   : > { %s36_s14 = sadd.s32 1, %s458_s10  ;;  %s47_s15 = sadd.s32 1, %s450_s8 }
   0x8   : > { %p38_p0 = scmp.ge.s32.totalorder %s36_s14, 2  ;;  %p54_p1 = scmp.ne.s32.totalorder %s450_s8, %s446_s7 }
   0x9   : > { %p55_p2 = scmp.eq.s32.totalorder %s462_s11, 0  ;;  %p60_p3 = scmp.ne.s32.totalorder %s446_s7, %s442_s6 }
   0xa   : > { %s672_s14 = smov (%p38_p0, %s36_s14), 0  ;;  %p61_p5 = scmp.eq.s32.totalorder %s276_s12, 0 }
   0xb   : > { %p518_p4 = por %p55_p2, %p54_p1  ;;  %s40_s17 = ssub.s32 %s458_s10, %s672_s14 }
   0xc   : > { %p86_p6 = scmp.eq.s32.totalorder %s276_s12, 1  ;;  %p45_p7 = scmp.eq.s32.totalorder %s40_s17, 0 }
   0xd   : > { %p524_p8 = por %p61_p5, %p60_p3  ;;  %p92_p10 = scmp.eq.s32.totalorder %s277_s13, 1 }
   0xe   : > { %p528_p9 = por %p86_p6, %p54_p1  ;;  %p299_p13 = scmp.lt.s32.totalorder %s462_s11, 2 }
   0xf   : > { %s533_s20 = scalar_select %p45_p7, %s450_s8, %s47_s15  }
  0x10   : > { %s658_s19 = scalar_select %p528_p9, 1, 0 }
  0x11   : > { %p535_p11 = por %p92_p10, %p60_p3  ;;  %s112_s22 = sand.u32 1, %s450_s8  }
  0x12   : > { %s280_s23 = sshll.u32 %s112_s22, 3  ;;  %s281_s24 = sshll.u32 %s458_s10, 7 }
  0x13   : > { %s659_s21 = scalar_select %p535_p11, 1, 0 }
  0x14   : > { %s546_s27 = scalar_lea.hbm %s653_s0, %s281_s24  ;;  %s116_s28 = scalar_lea.vmem [#allocation3], %s280_s23 }
  0x15   : > { %s125_s29 = sshll.u32 %s116_s28, 4  ;;  %p552_p0 = pnand %p299_p13, %p518_p4  ;;  %s548_s29 = int_to_ptr.vmem [resolvable:$true] %s125_s29 }
  0x16   : > { %s113_s2 = scalar_lea.sflag [#allocation4], %s112_s22  ;;  %s350_s3 = scalar_lea.hbm %s546_s27, 128 }
  0x17   : > { %p351_p3 = scmp.ne.s32.totalorder %s546_s27, %s350_s3  ;;  %p352_p5 = pneg %p552_p0 }
  0x18   : > { %s355_s12 = scalar_lea.hbm %s653_s0, 256  ;;  %p356_p4 = scmp.lt.u32.totalorder %s546_s27, %s653_s0 }
  0x19   : > { %p353_p6 = pnand %p352_p5, %p351_p3  ;;  %p357_p10 = scmp.lt.u32.totalorder %s355_s12, %s350_s3 }
  0x1a   : > { %p359_p12 = scmp.lt.u32.totalorder %s350_s3, %s546_s27 }
  0x1b   : > { %p354_p7 = pneg %p353_p6  ;;  %p358_p13 = por %p357_p10, %p356_p4 }
  0x1d   : > { %p360_p1 = por %p359_p12, %p358_p13 }
  0x1f   : > { %p361_p2 = pnand %p360_p1, %p354_p7 }
  0x21   : > { %364 = shalt.err (!%p361_p2)
}
  0x22   : > { %s365_s16 = scalar_lea.vmem %s548_s29, 128  ;;  %s464_s17 = smov [#allocation3]  }
  0x23   : > { %p366_p3 = scmp.ne.s32.totalorder %s548_s29, %s365_s16  ;;  %s370_s22 = sshll.u32 %s464_s17, 4  ;;  %s371_s22 = int_to_ptr.vmem [resolvable:$false] %s370_s22 }
  0x24   : > { %s372_s23 = scalar_lea.vmem %s371_s22, 256  ;;  %p373_p9 = scmp.lt.s32.totalorder %s548_s29, %s371_s22 }
  0x25   : > { %p368_p6 = pnand %p366_p3, %p352_p5  ;;  %p374_p4 = scmp.lt.s32.totalorder %s372_s23, %s365_s16 }
  0x27   : > { %p369_p11 = pneg %p368_p6  ;;  %p375_p10 = por %p374_p4, %p373_p9 }
  0x29   : > { %p376_p12 = pnand %p375_p10, %p369_p11 }
  0x2b   : > { %379 = shalt.err (!%p376_p12)
}
  0x2c   : > { %294 = dma.hbm_to_vmem [thread:$0]  (!%p552_p0), %s546_s27, 128, %s548_s29, %s113_s2  }
  0x2d   : > { %p661_p1 = scmp.lt.s32.totalorder %s462_s11, 3  ;;  %p662_p2 = scmp.ge.s32.totalorder %s462_s11, 1 }
  0x2f   : > { %p131_p5 = pnand %p662_p2, %p661_p1 }
  0x30   : > { %s588_s24 = sand.u32 (!%p131_p5), 1, %s446_s7  }
  0x31   : > { %134 = sbr.rel (%p131_p5) target bundleno = 95 (0x5f), region = 24  ;;  %s283_s25 = sshll.u32 (!%p131_p5), %s588_s24, 3 }
  0x32   : > { %s137_s26 = scalar_lea.sflag (!%p131_p5), [#allocation4], %s588_s24  ;;  %s140_s28 = scalar_lea.vmem (!%p131_p5), [#allocation3], %s283_s25 }
  0x38   : > { %433 = dma.done.wait (%p524_p8), %s137_s26, 128  }
  0x39   : > { %435 = vsyncadd (%p524_p8), %s137_s26, 4294967168  ;;  %vm162_vm0 = vcmask 253952   ;;  %v465_v0 = vmov -inf   ;;  %vm166_vm1 = vcmask 261120   ;;  %v164_v1 = vld [vmem:[%s140_s28] sm:$0xff]  ;;  %s157_s18 = scalar_lea.vmem [#allocation6], %s588_s24 }
  0x3a   : > { %163 = vst.msk [vmem:[#allocation2] sm:$0x1] %vm162_vm0, %v465_v0  ;;  %v167_v2 = vsel %vm166_vm1, %v164_v1, -inf  ;;  %s196_s27 = sshll.u32 %s157_s18, 4  ;;  %s284_s29 = sshll.u32 %s454_s9, 4  ;;  %s600_s27 = int_to_ptr.vmem [resolvable:$true] %s196_s27 }
  0x3b   : > { %v168_v3 = vrot.slane %v167_v2, 4  ;;  %s605_s3 = scalar_lea.hbm %s654_s1, %s284_s29  ;;  %s183_s4 = scalar_lea.sflag [#allocation5], %s588_s24 }
  0x3c   : > { %s380_s5 = scalar_lea.vmem %s600_s27, 16  ;;  %p663_p9 = scmp.ne.s32.totalorder %s658_s19, 0 }
  0x3d   : > { %v169_v4 = vmax.f32 %v167_v2, %v168_v3  ;;  %p381_p8 = scmp.ne.s32.totalorder %s600_s27, %s380_s5  ;;  %s466_s9 = smov [#allocation6]  }
  0x3e   : > { %s384_s12 = sshll.u32 %s466_s9, 4  ;;  %s385_s12 = int_to_ptr.vmem [resolvable:$false] %s384_s12 }
  0x3f   : > { %v170_v5 = vrot.slane %v169_v4, 2  ;;  %p382_p11 = pnand %p381_p8, %p663_p9  ;;  %s386_s13 = scalar_lea.vmem %s385_s12, 32 }
  0x40   : > { %p387_p7 = scmp.lt.s32.totalorder %s600_s27, %s385_s12  ;;  %p388_p13 = scmp.lt.s32.totalorder %s386_s13, %s380_s5 }
  0x41   : > { %v171_v6 = vmax.f32 %v169_v4, %v170_v5  ;;  %v165_v8 = vld [vmem:[#allocation2] sm:$0x1]  ;;  %p383_p0 = pneg %p382_p11 }
  0x42   : > { %p389_p3 = por %p388_p13, %p387_p7 }
  0x43   : > { %v172_v7 = vrot.slane %v171_v6, 1 }
  0x44   : > { %p390_p6 = pnand %p389_p3, %p383_p0 }
  0x45   : > { %v173_v9 = vmax.f32 %v171_v6, %v172_v7 }
  0x47   : > { %v174_v10 = vmax.f32 %v165_v8, %v173_v9 }
  0x49   : > { %176 = vst.msk [vmem:[#allocation2] sm:$0x1] %vm162_vm0, %v174_v10 }
  0x50   : > { %v180_v11 = vld [vmem:[#allocation2] sm:$0x1] }
  0x51   : > { %181 = vst.msk [vmem:[%s157_s18] sm:$0x1] %vm162_vm0, %v180_v11 }
  0x52   : > { %393 = shalt.err (!%p390_p6)
}
  0x53   : > { %s394_s15 = scalar_lea.hbm %s605_s3, 16  ;;  %s398_s22 = scalar_lea.hbm %s654_s1, 32 }
  0x54   : > { %p395_p4 = scmp.ne.s32.totalorder %s605_s3, %s394_s15  ;;  %p399_p1 = scmp.lt.u32.totalorder %s605_s3, %s654_s1 }
  0x55   : > { %p400_p2 = scmp.lt.u32.totalorder %s398_s22, %s394_s15  ;;  %p402_p8 = scmp.lt.u32.totalorder %s394_s15, %s605_s3 }
  0x56   : > { %p396_p10 = pnand %p395_p4, %p663_p9 }
  0x57   : > { %p401_p5 = por %p400_p2, %p399_p1 }
  0x58   : > { %p397_p12 = pneg %p396_p10 }
  0x59   : > { %p403_p11 = por %p402_p8, %p401_p5 }
  0x5b   : > { %p404_p0 = pnand %p403_p11, %p397_p12 }
  0x5d   : > { %407 = shalt.err (!%p404_p0)
}
  0x5e   : > { %289 = dma.vmem_to_hbm [thread:$0]  (%p663_p9), %s600_s27, 16, %s605_s3, %s183_s4  }
  0x5f PF: > { %s208_s25 = sand.u32 1, %s442_s6   ;;  %p664_p7 = scmp.ne.s32.totalorder %s659_s21, 0 }
  0x60   : > { %p665_p13 = scmp.ge.s32.totalorder %s462_s11, 2  ;;  %s209_s26 = scalar_lea.sflag [#allocation5], %s208_s25 }
  0x62   : > { %p296_p3 = pnand %p665_p13, %p664_p7 }
  0x64   : > { %437 = dma.done.wait (!%p296_p3), %s209_s26, 16  }
  0x65   : > { %439 = vsyncadd (!%p296_p3), %s209_s26, 4294967280  ;;  %s17_s11 = sadd.s32 1, %s462_s11   ;;  %s666_s6 = smov %s446_s7 }
  0x66   : > { %p14_p6 = scmp.ge.s32.totalorder %s17_s11, 4   ;;  %s667_s7 = smov %s450_s8 }
  0x67   : > { %s668_s8 = smov %s533_s20  ;;  %s669_s9 = smov %s458_s10 }
  0x68   : > { %s670_s10 = smov %s672_s14  ;;  %16 = sbr.rel (!%p14_p6) target bundleno = 6 (0x6), region = 77 }
  0x6f   :  { %213 = vsyncpa [#allocation4], 1 }
  0x70   :  { %215 = vsyncpa [#allocation4 + $0x1], 1 }
  0x71   :  { %216 = vsyncpa [#allocation5], 1 }
  0x72   :  { %218 = vsyncpa [#allocation5 + $0x1], 1 }

</bundles_post_ra>
